<compile_context>
chip_gen: v5e
topology: v5e:2x2
jax: 0.10.0
libtpu: 0.0.40
codegen_flags: <defaults>
</compile_context>

<pallas_src>
import functools

import jax
import jax.numpy as jnp
from jax import lax
from jax.experimental import pallas as pl
from jax.experimental.pallas import tpu as pltpu


# ----------------------------------------------------------------------------
# Kernel
# ----------------------------------------------------------------------------
def _softmax_predictor_kernel(x_ref, w_ref, b_ref, o_ref,
                              logits_ref, m_ref, l_ref,
                              *, block_v, vocab_size):
    p = pl.program_id(1)  # phase: 0 = accumulate online LSE, 1 = finalize
    j = pl.program_id(2)  # vocab tile index

    @pl.when((p == 0) & (j == 0))
    def _init():
        m_ref[...] = jnp.full(m_ref.shape, -jnp.inf, dtype=m_ref.dtype)
        l_ref[...] = jnp.zeros(l_ref.shape, dtype=l_ref.dtype)

    @pl.when(p == 0)
    def _accumulate():
        # [tb, H] @ [H, tv] on the MXU (bf16 operands, f32 accumulate) + bias.
        logits = jnp.dot(x_ref[...], w_ref[...],
                         preferred_element_type=jnp.float32)
        logits = logits + b_ref[...]

        # Mask vocab-padding columns of an overhanging last tile.  This branch
        # is trace-time: it costs nothing when block_v divides V.
        if vocab_size % block_v != 0:
            col = j * block_v + lax.broadcasted_iota(jnp.int32, logits.shape, 1)
            logits = jnp.where(col < vocab_size, logits, -jnp.inf)

        # Online (flash-style) log-sum-exp update, all in f32.
        m_old = m_ref[...]
        m_new = jnp.maximum(m_old, jnp.max(logits, axis=-1, keepdims=True))
        l_ref[...] = (jnp.exp(m_old - m_new) * l_ref[...]
                      + jnp.sum(jnp.exp(logits - m_new), axis=-1, keepdims=True))
        m_ref[...] = m_new

        # Stash raw logits (slab dtype is f32 when VMEM allows, else bf16).
        off = pl.multiple_of(j * block_v, block_v)
        logits_ref[:, pl.ds(off, block_v)] = logits.astype(logits_ref.dtype)

    @pl.when(p == 1)
    def _finalize():
        off = pl.multiple_of(j * block_v, block_v)
        lse = m_ref[...] + jnp.log(l_ref[...])
        o_ref[...] = (logits_ref[:, pl.ds(off, block_v)].astype(jnp.float32)
                      - lse).astype(o_ref.dtype)


# ----------------------------------------------------------------------------
# pallas_call wrapper (jitted; no weight cast inside)
# ----------------------------------------------------------------------------
@functools.partial(
    jax.jit,
    static_argnames=("block_b", "block_v", "out_dtype", "slab_dtype",
                     "vmem_limit_bytes"),
)
def _softmax_predictor_call(hidden_state, weight_t, bias, *, block_b, block_v,
                            out_dtype, slab_dtype, vmem_limit_bytes):
    B, H = hidden_state.shape
    Hw, V = weight_t.shape
    assert H == Hw, "weight_t must be [hidden, vocab] (pre-transposed)"

    nb = pl.cdiv(B, block_b)
    nv = pl.cdiv(V, block_v)

    # Only the (small) activation is cast to the weight's MXU dtype; the
    # (large) weight is used as stored -- keep it in bf16 at rest.
    x = hidden_state.astype(weight_t.dtype)
    b2 = bias.reshape(1, V).astype(jnp.float32)

    kernel = functools.partial(_softmax_predictor_kernel,
                               block_v=block_v, vocab_size=V)

    return pl.pallas_call(
        kernel,
        out_shape=jax.ShapeDtypeStruct((B, V), out_dtype),
        grid_spec=pltpu.PrefetchScalarGridSpec(
            num_scalar_prefetch=0,
            grid=(nb, 2, nv),
            in_specs=[
                # x tile: resident across phase/vocab iterations.
                pl.BlockSpec((block_b, H), lambda i, p, j: (i, 0)),
                # W tile follows the vocab index in phase 0; in phase 1 it is
                # pinned to the LAST phase-0 tile so no redundant W DMA fires
                # at the phase boundary.
                pl.BlockSpec((H, block_v),
                             lambda i, p, j: (0, j * (1 - p) + (nv - 1) * p)),
                # bias tile: same mapping as W.
                pl.BlockSpec((1, block_v),
                             lambda i, p, j: (0, j * (1 - p) + (nv - 1) * p)),
            ],
            # Output tile is only written (lane-dense) in the finalize phase.
            out_specs=pl.BlockSpec((block_b, block_v),
                                   lambda i, p, j: (i, j * p)),
            scratch_shapes=[
                pltpu.VMEM((block_b, nv * block_v), slab_dtype),  # raw logits
                pltpu.VMEM((block_b, 1), jnp.float32),            # running max
                pltpu.VMEM((block_b, 1), jnp.float32),            # running sum
            ],
        ),
        compiler_params=pltpu.CompilerParams(
            dimension_semantics=("parallel", "arbitrary", "arbitrary"),
            vmem_limit_bytes=vmem_limit_bytes,
        ),
    )(x, weight_t, b2)


# ----------------------------------------------------------------------------
# VMEM-budget-aware configuration chooser
# ----------------------------------------------------------------------------
def _round_up(x, m):
    return ((x + m - 1) // m) * m


def _generation_defaults():
    """Per-generation targets: (block_b, block_v, vmem_limit_bytes, cores)."""
    kind = ""
    try:
        kind = jax.devices()[0].device_kind.lower()
    except Exception:  # pragma: no cover - defensive fallback
        pass
    if "v7" in kind:                 # v7x: 64 MiB VMEM, 2 TensorCores
        return 256, 512, 48 * 1024 * 1024, 2
    if "v6" in kind:                 # v6e: 128 MiB VMEM -> raise limit to 100
        return 256, 1024, 100 * 1024 * 1024, 1
    if "v5" in kind:                 # v5e: 128 MiB VMEM -> raise limit to 100
        return 128, 512, 100 * 1024 * 1024, 1
    return 128, 512, 48 * 1024 * 1024, 1   # safe everywhere


def _bb_candidates(B, target):
    """Descending legal block_b candidates (multiple of 8 or == B)."""
    if B <= 8:
        return [B]
    cands = []
    top = min(target, B)
    if top == B:
        cands.append(B)
    bb = (top // 8) * 8
    while bb >= 8:
        if bb not in cands:
            cands.append(bb)
        bb //= 2
        bb = (bb // 8) * 8
    return sorted(set(cands), reverse=True) or [min(B, 8)]


def _bv_candidates(V, target):
    """Descending legal block_v candidates (multiple of 128 or == V)."""
    cands = []
    if V <= max(target, 128):
        cands.append(V)
    bv = min(target, (V // 128) * 128)
    while bv >= 128:
        if bv not in cands:
            cands.append(bv)
        bv //= 2
        bv = (bv // 128) * 128
    return sorted(set(cands), reverse=True) or [V]


def _vmem_usage(bb, bv, H, V, mxu_bytes, out_bytes, slab_bytes):
    nv = -(-V // bv)
    return (2 * H * bv * mxu_bytes          # W double buffer
            + 2 * bb * H * mxu_bytes        # x double buffer
            + 2 * bb * bv * out_bytes       # out double buffer
            + 2 * 8 * bv * 4                # bias double buffer (sublane-padded)
            + bb * (nv * bv) * slab_bytes   # raw-logits slab scratch
            + 2 * bb * 128 * 4)             # m / l scratch (lane-padded)


def _choose_config(B, H, V, w_dtype, out_dtype, block_b, block_v,
                   vmem_limit_bytes):
    tgt_bb, tgt_bv, dflt_vmem, cores = _generation_defaults()
    vmem_limit = dflt_vmem if vmem_limit_bytes is None else vmem_limit_bytes
    budget = int(vmem_limit * 0.9)          # headroom for compiler scratch

    # Megacore (v7x): guarantee >= 2 batch tiles so both cores get work.
    if cores >= 2 and B > 8:
        tgt_bb = min(tgt_bb, _round_up(-(-B // 2), 8))

    bb_cands = [block_b] if block_b is not None else _bb_candidates(B, tgt_bb)
    bv_cands = [block_v] if block_v is not None else _bv_candidates(V, tgt_bv)

    mxu_bytes = jnp.dtype(w_dtype).itemsize
    out_bytes = jnp.dtype(out_dtype).itemsize

    # First pass keeps block_v at/above 512 lanes (HBM-roofline knee); if
    # nothing fits, second pass allows any block_v.
    for bv_floor in (min(512, max(bv_cands)), 0):
        for bb in bb_cands:                       # biggest batch tile first
            for bv in bv_cands:                   # biggest vocab tile first
                if bv < bv_floor:
                    continue
                for slab_dtype in (jnp.float32, jnp.bfloat16):
                    use = _vmem_usage(bb, bv, H, V, mxu_bytes, out_bytes,
                                      jnp.dtype(slab_dtype).itemsize)
                    if use <= budget:
                        return bb, bv, slab_dtype, vmem_limit

    # Fallback: smallest tiles + bf16 slab.  For extreme vocabs the right fix
    # is an HBM round-trip of the unshifted logits (phase-0 write + aliased
    # phase-1 re-read via input_output_aliases) -- not implemented here.
    return bb_cands[-1], bv_cands[-1], jnp.bfloat16, vmem_limit


# ----------------------------------------------------------------------------
# Public API
# ----------------------------------------------------------------------------
def softmax_predictor(hidden_state, weight_t, bias, *, block_b=None,
                      block_v=None, out_dtype=jnp.bfloat16,
                      vmem_limit_bytes=None):
    """hidden_state: [B, H]; weight_t: [H, V] (keep in bf16 at rest);
    bias: [V] -> log-probs [B, V] (default bf16)."""
    B, H = hidden_state.shape
    Hw, V = weight_t.shape
    assert H == Hw, "weight_t must be [hidden, vocab] (pre-transposed)"

    bb, bv, slab_dtype, vmem = _choose_config(
        B, H, V, weight_t.dtype, out_dtype, block_b, block_v, vmem_limit_bytes)

    return _softmax_predictor_call(
        hidden_state, weight_t, bias,
        block_b=bb, block_v=bv, out_dtype=out_dtype, slab_dtype=slab_dtype,
        vmem_limit_bytes=vmem)


def init_params(key, hidden_size, vocab_size, *, w_dtype=jnp.bfloat16,
                b_dtype=jnp.float32):
    """Deterministic init mimicking nn.Linear: U(-1/sqrt(H), 1/sqrt(H)).
    W is stored pre-transposed [hidden, vocab] and kept in bf16 at rest so no
    per-call f32->bf16 cast (extra HBM pass) is needed."""
    kw, kb = jax.random.split(key)
    bound = float(hidden_size) ** -0.5
    weight_t = jax.random.uniform(
        kw, (hidden_size, vocab_size), dtype=jnp.float32,
        minval=-bound, maxval=bound).astype(w_dtype)
    bias = jax.random.uniform(
        kb, (vocab_size,), dtype=jnp.float32,
        minval=-bound, maxval=bound).astype(b_dtype)
    return weight_t, bias


# ----------------------------------------------------------------------------
# Demo / self-test
# ----------------------------------------------------------------------------
if __name__ == "__main__":
    # Small shapes chosen to exercise batch padding (B=10 vs block_b=8) and
    # vocab tiling + masking (V=192 vs block_v=128 -> 2 vocab tiles, 64 padded)
    # in run 1, and the default budget-driven chooser in run 2.
    config = {"hidden_size": 32, "vocab_size": 192}
    batch = 10

    key = jax.random.PRNGKey(0)
    k_x, k_p = jax.random.split(key)

    hidden_state = jax.random.normal(
        k_x, (batch, config["hidden_size"]), dtype=jnp.float32)
    weight_t, bias = init_params(
        k_p, config["hidden_size"], config["vocab_size"])  # W in bf16 at rest

    # Reference with the same bf16-rounded operands, f32 math.
    xq = hidden_state.astype(jnp.bfloat16).astype(jnp.float32)
    wq = weight_t.astype(jnp.float32)
    ref = jax.nn.log_softmax(xq @ wq + bias, axis=-1)

    # Run 1: explicit small tiles (batch overhang + vocab mask), f32 output
    # for a tight numerical check.
    out1 = softmax_predictor(hidden_state, weight_t, bias,
                             block_b=8, block_v=128, out_dtype=jnp.float32)
    out1 = jax.block_until_ready(out1)
    assert out1.shape == (batch, config["vocab_size"])
    assert bool(jnp.all(jnp.isfinite(out1)))
    assert jnp.allclose(out1, ref, atol=2e-3, rtol=2e-3)

    # Run 2: defaults (budget-driven tiles, bf16 output).
    out2 = softmax_predictor(hidden_state, weight_t, bias)
    out2 = jax.block_until_ready(out2)
    assert out2.shape == (batch, config["vocab_size"])
    assert out2.dtype == jnp.bfloat16
    assert bool(jnp.all(jnp.isfinite(out2.astype(jnp.float32))))
    assert jnp.allclose(out2.astype(jnp.float32), ref, atol=4e-2, rtol=4e-2)

    print("KERNEL_OK")
</pallas_src>

<mosaic_0001>
module attributes {stable_mosaic.version = 11 : i64} {
  func.func @_softmax_predictor_kernel(%arg0: i32, %arg1: i32, %arg2: i32, %arg3: memref<8x32xbf16, #tpu.memory_space<vmem>>, %arg4: memref<32x128xbf16, #tpu.memory_space<vmem>>, %arg5: memref<1x128xf32, #tpu.memory_space<vmem>>, %arg6: memref<8x128xf32, #tpu.memory_space<vmem>>, %arg7: memref<8x256xf32, #tpu.memory_space<vmem>>, %arg8: memref<8x1xf32, #tpu.memory_space<vmem>>, %arg9: memref<8x1xf32, #tpu.memory_space<vmem>>) attributes {dimension_semantics = [#tpu.dimension_semantics<parallel>, #tpu.dimension_semantics<arbitrary>, #tpu.dimension_semantics<arbitrary>], iteration_bounds = array<i64: 2, 2, 2>, scalar_prefetch = 0 : i64, scratch_operands = 3 : i64, tpu.core_type = #tpu.core_type<tc>, window_params = [{transform_indices = @transform_0, window_bounds = array<i64: 8, 32>}, {transform_indices = @transform_1, window_bounds = array<i64: 32, 128>}, {transform_indices = @transform_2, window_bounds = array<i64: 1, 128>}, {transform_indices = @transform_3, window_bounds = array<i64: 8, 128>}]} {
    %c0_i32 = arith.constant 0 : i32
    %0 = arith.cmpi eq, %arg1, %c0_i32 : i32
    %c0_i32_0 = arith.constant 0 : i32
    %1 = arith.cmpi eq, %arg2, %c0_i32_0 : i32
    %2 = arith.andi %0, %1 : i1
    %3 = arith.extui %2 : i1 to i32
    %c0_i32_1 = arith.constant 0 : i32
    %4 = arith.cmpi ne, %3, %c0_i32_1 : i32
    scf.if %4 {
      %cst = arith.constant 0xFF800000 : f32
      %11 = vector.broadcast %cst : f32 to vector<8x1xf32>
      %c0 = arith.constant 0 : index
      %c0_5 = arith.constant 0 : index
      %12 = vector.load %arg8[%c0, %c0_5] : memref<8x1xf32, #tpu.memory_space<vmem>>, vector<8x1xf32>
      tpu.vector_store %arg8[%c0, %c0_5], %11 {strides = array<i32>} : memref<8x1xf32, #tpu.memory_space<vmem>>, vector<8x1xf32>,
      %cst_6 = arith.constant 0.000000e+00 : f32
      %13 = vector.broadcast %cst_6 : f32 to vector<8x1xf32>
      %c0_7 = arith.constant 0 : index
      %c0_8 = arith.constant 0 : index
      %14 = vector.load %arg9[%c0_7, %c0_8] : memref<8x1xf32, #tpu.memory_space<vmem>>, vector<8x1xf32>
      tpu.vector_store %arg9[%c0_7, %c0_8], %13 {strides = array<i32>} : memref<8x1xf32, #tpu.memory_space<vmem>>, vector<8x1xf32>,
    } else {
    }
    %c0_i32_2 = arith.constant 0 : i32
    %5 = arith.cmpi eq, %arg1, %c0_i32_2 : i32
    %6 = arith.extui %5 : i1 to i32
    %c0_i32_3 = arith.constant 0 : i32
    %7 = arith.cmpi ne, %6, %c0_i32_3 : i32
    scf.if %7 {
      %c0 = arith.constant 0 : index
      %c0_5 = arith.constant 0 : index
      %11 = vector.load %arg3[%c0, %c0_5] : memref<8x32xbf16, #tpu.memory_space<vmem>>, vector<8x32xbf16>
      %c0_6 = arith.constant 0 : index
      %c0_7 = arith.constant 0 : index
      %12 = vector.load %arg4[%c0_6, %c0_7] : memref<32x128xbf16, #tpu.memory_space<vmem>>, vector<32x128xbf16>
      %cst = arith.constant dense<0.000000e+00> : vector<8x128xf32>
      %13 = tpu.matmul %11, %12, %cst {dimension_numbers = #tpu.dot_dimension_numbers<[1], [0], [0], [1], [0, 0, 1, 1], [], []>} : vector<8x32xbf16>, vector<32x128xbf16>, vector<8x128xf32> -> vector<8x128xf32>
      %c0_8 = arith.constant 0 : index
      %c0_9 = arith.constant 0 : index
      %14 = vector.load %arg5[%c0_8, %c0_9] : memref<1x128xf32, #tpu.memory_space<vmem>>, vector<1x128xf32>
      %15 = vector.broadcast %14 : vector<1x128xf32> to vector<8x128xf32>
      %16 = arith.addf %13, %15 : vector<8x128xf32>
      %c128_i32 = arith.constant 128 : i32
      %17 = arith.muli %arg2, %c128_i32 : i32
      %18 = tpu.iota {dimensions = array<i32: 1>} : vector<8x128xi32>
      %19 = vector.broadcast %17 : i32 to vector<8x128xi32>
      %20 = arith.addi %19, %18 : vector<8x128xi32>
      %c192_i32 = arith.constant 192 : i32
      %21 = vector.broadcast %c192_i32 : i32 to vector<8x128xi32>
      %22 = arith.cmpi slt, %20, %21 : vector<8x128xi32>
      %cst_10 = arith.constant 0xFF800000 : f32
      %23 = vector.broadcast %cst_10 : f32 to vector<8x128xf32>
      %24 = arith.select %22, %16, %23 : vector<8x128xi1>, vector<8x128xf32>
      %c0_11 = arith.constant 0 : index
      %c0_12 = arith.constant 0 : index
      %25 = vector.load %arg8[%c0_11, %c0_12] : memref<8x1xf32, #tpu.memory_space<vmem>>, vector<8x1xf32>
      %cst_13 = arith.constant dense<0xFF800000> : vector<8xf32>
      %26 = vector.multi_reduction <maximumf>, %24, %cst_13 [1] : vector<8x128xf32> to vector<8xf32>
      %27 = vector.shape_cast %26 : vector<8xf32> to vector<8x1xf32>
      %28 = arith.maximumf %25, %27 : vector<8x1xf32>
      %29 = arith.subf %25, %28 : vector<8x1xf32>
      %30 = math.exp %29 : vector<8x1xf32>
      %c0_14 = arith.constant 0 : index
      %c0_15 = arith.constant 0 : index
      %31 = vector.load %arg9[%c0_14, %c0_15] : memref<8x1xf32, #tpu.memory_space<vmem>>, vector<8x1xf32>
      %32 = arith.mulf %30, %31 : vector<8x1xf32>
      %33 = vector.broadcast %28 : vector<8x1xf32> to vector<8x128xf32>
      %34 = arith.subf %24, %33 : vector<8x128xf32>
      %35 = math.exp %34 : vector<8x128xf32>
      %cst_16 = arith.constant dense<0.000000e+00> : vector<8xf32>
      %36 = vector.multi_reduction <add>, %35, %cst_16 [1] : vector<8x128xf32> to vector<8xf32>
      %37 = vector.shape_cast %36 : vector<8xf32> to vector<8x1xf32>
      %38 = arith.addf %32, %37 : vector<8x1xf32>
      %c0_17 = arith.constant 0 : index
      %c0_18 = arith.constant 0 : index
      %39 = vector.load %arg9[%c0_17, %c0_18] : memref<8x1xf32, #tpu.memory_space<vmem>>, vector<8x1xf32>
      tpu.vector_store %arg9[%c0_17, %c0_18], %38 {strides = array<i32>} : memref<8x1xf32, #tpu.memory_space<vmem>>, vector<8x1xf32>,
      %c0_19 = arith.constant 0 : index
      %c0_20 = arith.constant 0 : index
      %40 = vector.load %arg8[%c0_19, %c0_20] : memref<8x1xf32, #tpu.memory_space<vmem>>, vector<8x1xf32>
      tpu.vector_store %arg8[%c0_19, %c0_20], %28 {strides = array<i32>} : memref<8x1xf32, #tpu.memory_space<vmem>>, vector<8x1xf32>,
      %c128_i32_21 = arith.constant 128 : i32
      %41 = arith.muli %arg2, %c128_i32_21 : i32
      %42 = tpu.assume_multiple %41, 128 : i32
      %c0_22 = arith.constant 0 : index
      %43 = arith.index_cast %42 : i32 to index
      %44 = vector.load %arg7[%c0_22, %43] : memref<8x256xf32, #tpu.memory_space<vmem>>, vector<8x128xf32>
      tpu.vector_store %arg7[%c0_22, %43], %24 {strides = array<i32>} : memref<8x256xf32, #tpu.memory_space<vmem>>, vector<8x128xf32>,
    } else {
    }
    %c1_i32 = arith.constant 1 : i32
    %8 = arith.cmpi eq, %arg1, %c1_i32 : i32
    %9 = arith.extui %8 : i1 to i32
    %c0_i32_4 = arith.constant 0 : i32
    %10 = arith.cmpi ne, %9, %c0_i32_4 : i32
    scf.if %10 {
      %c128_i32 = arith.constant 128 : i32
      %11 = arith.muli %arg2, %c128_i32 : i32
      %12 = tpu.assume_multiple %11, 128 : i32
      %c0 = arith.constant 0 : index
      %c0_5 = arith.constant 0 : index
      %13 = vector.load %arg8[%c0, %c0_5] : memref<8x1xf32, #tpu.memory_space<vmem>>, vector<8x1xf32>
      %c0_6 = arith.constant 0 : index
      %c0_7 = arith.constant 0 : index
      %14 = vector.load %arg9[%c0_6, %c0_7] : memref<8x1xf32, #tpu.memory_space<vmem>>, vector<8x1xf32>
      %15 = math.log %14 : vector<8x1xf32>
      %16 = arith.addf %13, %15 : vector<8x1xf32>
      %c0_8 = arith.constant 0 : index
      %17 = arith.index_cast %12 : i32 to index
      %18 = vector.load %arg7[%c0_8, %17] : memref<8x256xf32, #tpu.memory_space<vmem>>, vector<8x128xf32>
      %19 = vector.broadcast %16 : vector<8x1xf32> to vector<8x128xf32>
      %20 = arith.subf %18, %19 : vector<8x128xf32>
      %c0_9 = arith.constant 0 : index
      %c0_10 = arith.constant 0 : index
      %21 = vector.load %arg6[%c0_9, %c0_10] : memref<8x128xf32, #tpu.memory_space<vmem>>, vector<8x128xf32>
      tpu.vector_store %arg6[%c0_9, %c0_10], %20 {strides = array<i32>} : memref<8x128xf32, #tpu.memory_space<vmem>>, vector<8x128xf32>,
    } else {
    }
    return
  }
  func.func @transform_0(%arg0: i32, %arg1: i32, %arg2: i32) -> (i32, i32) {
    %c0_i32 = arith.constant 0 : i32
    %c0_i32_0 = arith.constant 0 : i32
    return %arg0, %c0_i32 : i32, i32
  }
  func.func @transform_1(%arg0: i32, %arg1: i32, %arg2: i32) -> (i32, i32) {
    %c1_i32 = arith.constant 1 : i32
    %0 = arith.subi %c1_i32, %arg1 : i32
    %1 = arith.muli %arg2, %0 : i32
    %c1_i32_0 = arith.constant 1 : i32
    %2 = arith.muli %c1_i32_0, %arg1 : i32
    %3 = arith.addi %1, %2 : i32
    %c0_i32 = arith.constant 0 : i32
    %c0_i32_1 = arith.constant 0 : i32
    return %c0_i32, %3 : i32, i32
  }
  func.func @transform_2(%arg0: i32, %arg1: i32, %arg2: i32) -> (i32, i32) {
    %c1_i32 = arith.constant 1 : i32
    %0 = arith.subi %c1_i32, %arg1 : i32
    %1 = arith.muli %arg2, %0 : i32
    %c1_i32_0 = arith.constant 1 : i32
    %2 = arith.muli %c1_i32_0, %arg1 : i32
    %3 = arith.addi %1, %2 : i32
    %c0_i32 = arith.constant 0 : i32
    %c0_i32_1 = arith.constant 0 : i32
    return %c0_i32, %3 : i32, i32
  }
  func.func @transform_3(%arg0: i32, %arg1: i32, %arg2: i32) -> (i32, i32) {
    %0 = arith.muli %arg2, %arg1 : i32
    %c0_i32 = arith.constant 0 : i32
    return %arg0, %0 : i32, i32
  }
}

</mosaic_0001>

<bundles_post_ra>
// kernel: _softmax_predictor_call.1
= control target key start
LH: loop header
LB: loop body
LE: loop exit
PB: predicated region body
PF: predicated region fallthrough
CT: control target
= control target key end

     0   :  { %s1129_s0 = inlined_call_operand.vmem [shape: bf16[10,32], index: 0, kind: input, shape index: {}]   ;;  %s1130_s1 = inlined_call_operand.hbm [shape: bf16[32,192], index: 1, kind: input, shape index: {}]   ;;  %s1131_s2 = inlined_call_operand.vmem [shape: f32[1,192], index: 2, kind: input, shape index: {}]   ;;  %s1132_s3 = inlined_call_operand.hbm [shape: f32[10,192], index: 3, kind: output, shape index: {}]  }
   0x1   :  { %1141 = sst [smem:[#allocation18_spill]] %s1132_s3 }
   0x2   :  { %8 = vsyncpa [#allocation6], 0 }
   0x3   :  { %10 = vsyncpa [#allocation6 + $0x1], 0 }
   0x4   :  { %11 = vsyncpa [#allocation7], 0 }
   0x5   :  { %13 = vsyncpa [#allocation7 + $0x1], 0  ;;  %s883_s12 = smov 0   ;;  %s885_s13 = smov 0  }
   0x6   :  { %s887_s14 = smov 0   ;;  %s889_s15 = smov 0  }
   0x7   :  { %s891_s16 = smov 0   ;;  %s893_s17 = smov 0  }
   0x8   :  { %s895_s18 = smov 0   ;;  %s897_s19 = smov 0  }
   0x9   :  { %s899_s20 = smov 0   ;;  %s901_s21 = smov 0  }
   0xa   :  { %s903_s22 = smov 0   ;;  %s905_s23 = smov 0  }
   0xb   :  { %s907_s24 = smov 0  }
   0xc LB: > { %1142 = sst [smem:[#allocation11_spill]] %s842_s21  ;;  %s1133_s25 = sadd.s32 4294967295, %s854_s24   ;;  %s854_s24 = sphi %s907_s24, %s19_s24   ;;  %s850_s23 = sphi %s905_s23, %s1163_s23   ;;  %s846_s22 = sphi %s903_s22, %s1162_s22   ;;  %s842_s21 = sphi %s901_s21, %s1161_s21   ;;  %s838_s20 = sphi %s899_s20, %s1160_s20   ;;  %s834_s19 = sphi %s897_s19, %s1159_s19   ;;  %s830_s18 = sphi %s895_s18, %s1158_s18   ;;  %s826_s17 = sphi %s893_s17, %s1169_s17   ;;  %s822_s16 = sphi %s891_s16, %s1168_s16   ;;  %s818_s15 = sphi %s889_s15, %s1167_s15   ;;  %s814_s14 = sphi %s887_s14, %s1166_s14   ;;  %s810_s13 = sphi %s885_s13, %s1165_s13   ;;  %s806_s12 = sphi %s883_s12, %s1164_s12  }
   0xd   : > { %1143 = sst [smem:[#allocation12_spill]] %s846_s22  ;;  %s31_s27 = sadd.s32 1, %s842_s21 }
   0xe   : > { %1144 = sst [smem:[#allocation13_spill]] %s850_s23  ;;  %s34_s28 = sadd.s32 1, %s846_s22 }
   0xf   : > { %p32_p0 = scmp.ge.s32.totalorder %s31_s27, 2  ;;  %s38_s29 = sadd.s32 1, %s850_s23 }
  0x10   : > { %s68_s30 = ssub.s32 1, %s846_s22  ;;  %s77_s4 = sadd.s32 1, %s826_s17 }
  0x11   : > { %s1171_s27 = smov (%p32_p0, %s31_s27), 0  ;;  %s1173_s28 = smov (!%p32_p0, %s34_s28), %s846_s22 }
  0x12   : > { %1145 = sst [smem:[#allocation14_spill]] %s1171_s27  ;;  %s69_s5 = smul.u32 %s842_s21, %s68_s30 }
  0x13   : > { %p84_p1 = scmp.ne.s32.totalorder %s826_s17, %s822_s16  ;;  %p36_p2 = scmp.ge.s32.totalorder %s1173_s28, 2 }
  0x14   : > { %p85_p3 = scmp.eq.s32.totalorder %s854_s24, 0  ;;  %s963_s6 = sadd.s32 %s846_s22, %s69_s5 }
  0x15   : > { %p90_p4 = scmp.ne.s32.totalorder %s822_s16, %s818_s15  ;;  %s1175_s28 = smov (%p36_p2, %s1173_s28), 0 }
  0x16   : > { %1146 = sst [smem:[#allocation15_spill]] %s1175_s28  ;;  %s1177_s29 = smov (!%p36_p2, %s38_s29), %s850_s23 }
  0x17   : > { %s71_s7 = ssub.s32 1, %s1175_s28  ;;  %p971_p5 = por %p85_p3, %p84_p1 }
  0x18   : > { %p40_p6 = scmp.ge.s32.totalorder %s1177_s29, 2  ;;  %s72_s9 = smul.u32 %s71_s7, %s1171_s27 }
  0x19   : > { %p91_p7 = scmp.eq.s32.totalorder %s1133_s25, 0  ;;  %s132_s10 = smul.u32 %s842_s21, %s846_s22 }
  0x1a   : > { %s1179_s29 = smov (%p40_p6, %s1177_s29), 0  ;;  %s73_s11 = sadd.s32 %s72_s9, %s1175_s28 }
  0x1b   : > { %1148 = sst [smem:[#allocation16_spill]] %s1179_s29  ;;  %p983_p8 = por %p91_p7, %p90_p4 }
  0x1c   : > { %s74_s30 = ssub.s32 %s963_s6, %s73_s11  ;;  %s133_s5 = smul.u32 %s1175_s28, %s1171_s27 }
  0x1d   : > { %p75_p9 = scmp.eq.s32.totalorder %s74_s30, 0  ;;  %s134_s7 = ssub.s32 %s850_s23, %s1179_s29 }
  0x1e   : > { %s135_s26 = ssub.s32 %s132_s10, %s133_s5  ;;  %s139_s25 = sadd.s32 1, %s814_s14 }
  0x1f   : > { %s994_s22 = scalar_select %p75_p9, %s826_s17, %s77_s4  }
  0x20   : > { %s136_s21 = sor.u32 %s135_s26, %s134_s7  ;;  %p149_p10 = scmp.ne.s32.totalorder %s814_s14, %s810_s13 }
  0x21   : > { %1150 = sst [smem:[#allocation17_spill]] %s994_s22  ;;  %p137_p11 = scmp.eq.s32.totalorder %s136_s21, 0 }
  0x22   : > { %s1151_s3 = sadd.s32 4294967295, %s854_s24   ;;  %p155_p13 = scmp.ne.s32.totalorder %s810_s13, %s806_s12 }
  0x23   : > { %p150_p12 = scmp.eq.s32.totalorder %s1151_s3, 7  ;;  %s1152_s9 = sadd.s32 4294967294, %s854_s24  }
  0x24   : > { %p156_p0 = scmp.eq.s32.totalorder %s1152_s9, 7  ;;  %p564_p3 = scmp.lt.s32.totalorder %s854_s24, 8 }
  0x25   : > { %s1005_s11 = scalar_select %p137_p11, %s814_s14, %s139_s25  }
  0x26   : > { %p1007_p1 = por %p150_p12, %p149_p10  ;;  %p1011_p2 = por %p156_p0, %p155_p13 }
  0x27   : > { %s183_s26 = sand.u32 1, %s826_s17   ;;  %s525_s21 = sshll.u32 %s963_s6, 2 }
  0x28   : > { %s524_s3 = sshll.u32 %s183_s26, 4  ;;  %s194_s7 = scalar_lea.hbm %s1130_s1, %s525_s21 }
  0x29   : > { %s195_s9 = sshll.u32 %s194_s7, 4  ;;  %s187_s25 = scalar_lea.vmem [#allocation5], %s524_s3  ;;  %s196_s9 = int_to_ptr.hbm [resolvable:$true] %s195_s9 }
  0x2a   : > { %s197_s29 = sshll.u32 %s187_s25, 4  ;;  %p557_p4 = pnand %p564_p3, %p971_p5  ;;  %s198_s29 = int_to_ptr.vmem [resolvable:$true] %s197_s29 }
  0x2b   : > { %p526_p6 = scmp.ge.s32.totalorder %s854_s24, 1  ;;  %s184_s28 = scalar_lea.sflag [#allocation6], %s183_s26 }
  0x2c   : > { %s856_s27 = smov 128   ;;  %s857_s23 = smov 64  }
  0x2d   : > { %s858_s22 = smov 4   ;;  %p217_p7 = scmp.lt.s32.totalorder %s854_s24, 9 }
  0x2e   : > { %559 = dma.hbm_to_vmem [thread:$0]  (!%p557_p4), %s196_s9, 256, %s198_s29, %s184_s28, %s856_s27, %s857_s23, %s858_s22  }
  0x2f   : > { %p218_p9 = pnand %p526_p6, %p217_p7 }
  0x30   : > { %s223_s6 = sand.u32 (!%p218_p9), 1, %s822_s16  }
  0x31   : > { %221 = sbr.rel (%p218_p9) target bundleno = 736 (0x2e0), region = 32  ;;  %s1026_s21 = sshll.u32 (!%p218_p9), %s223_s6, 4 }
  0x32   : > { %s224_s3 = scalar_lea.sflag (!%p218_p9), [#allocation6], %s223_s6  ;;  %s227_s4 = scalar_lea.vmem (!%p218_p9), [#allocation5], %s1026_s21 }
  0x36   : > { %797 = dma.done.wait (%p983_p8), %s224_s3, 256  }
  0x37   : > { %799 = vsyncadd (%p983_p8), %s224_s3, 4294967040  ;;  %s258_s22 = sand.u32 1, %s810_s13   ;;  %p261_p5 = scmp.lt.s32.totalorder %s838_s20, 1 }
  0x38   : > { %s1037_s23 = sshll.u32 %s258_s22, 3  ;;  %s268_s27 = ssub.s32 1, %s834_s19 }
  0x39   : > { %s269_s28 = smul.u32 %s830_s18, %s268_s27  ;;  %p279_p8 = scmp.eq.s32.totalorder %s834_s19, 0 }
  0x3a   : > { %s262_s29 = scalar_select %p261_p5, %s838_s20, 1 }
  0x3b   : > { %s270_s8 = sadd.s32 %s834_s19, %s269_s28  ;;  %p280_p11 = scmp.eq.s32.totalorder %s830_s18, 0 }
  0x3c   : > { %s529_s15 = sshll.u32 %s262_s29, 2  ;;  %p271_p10 = scmp.lt.s32.totalorder %s270_s8, 1 }
  0x3d   : > { %s264_s7 = scalar_lea.vmem %s1129_s0, %s529_s15  ;;  %p281_p12 = pnand %p280_p11, %p279_p8 }
  0x3e   : > { %s1181_s8 = smov (!%p271_p10, %s270_s8), 1  ;;  %s260_s21 = scalar_lea.vmem [#allocation8], %s1037_s23 }
  0x3f   : > { %s273_s6 = scalar_lea.vmem %s1131_s2, %s1181_s8  ;;  %284 = sbr.rel (%p281_p12) target bundleno = 71 (0x47), region = 40 }
  0x44   : > { %vm285_vm0 = vcmask 7168   ;;  %v859_v0 = vmov -inf   ;;  %v860_v1 = vmov 0.0  }
  0x45   : > { %286 = vst.msk [vmem:[#allocation3] sm:$0xff] %vm285_vm0, %v859_v0 }
  0x46   : > { %287 = vst.msk [vmem:[#allocation4] sm:$0xff] %vm285_vm0, %v860_v1 }
  0x47 PF: > { %p530_p13 = scmp.ne.s32.totalorder %s834_s19, 0 }
  0x48   : > { %s540_s3 = sshll.u32 (!%p530_p13), %s830_s18, 7 }
  0x49   : > { %290 = sbr.rel (%p530_p13) target bundleno = 578 (0x242), region = 44  ;;  %s359_s27 = sshra.s32 (!%p530_p13), %s540_s3, 7 }
  0x4a   : > { %s541_s28 = sshll.u32 (!%p530_p13), %s359_s27, 3 }
  0x4b   : > { %s362_s29 = scalar_lea.vmem (!%p530_p13), [#allocation2], %s541_s28 }
  0x4e   : > { %v551_v2 = vld [vmem:[%s227_s4 + $0x8] sm:$0xff]  ;;  %v550_v3 = vld [vmem:[%s227_s4] sm:$0xff]  ;;  %vm312_vm1 = vcmask 261120   ;;  %v330_v5 = vlaneseq  ;;  %v332_v7 = vstv %s540_s3  ;;  %v861_v14 = vmov 0  }
  0x4f   : > { %322 = vmatpush.bf16.msra.mxu0 %v551_v2  ;;  %v291_v4 = vld [vmem:[%s264_s7] sm:$0xf]  ;;  %677 = vset.pattern.permute.xlu0 %v861_v14  ;;  %v336_v15 = vld [vmem:[#allocation3] sm:$0xff]  ;;  %vm356_vm3 = vcmask 7168   ;;  %v343_v25 = vld [vmem:[#allocation4] sm:$0xff] }
  0x50   : > { %v331_v6 = vand.u32 127, %v330_v5  ;;  %v678_v9 = vld [vmem:[%s273_s6] ss:$0 sm:$0xff] }
  0x52   : > { %v333_v8 = vadd.s32 %v332_v7, %v331_v6 }
  0x53   : > { %323 = vmatpush.bf16.msra.mxu0 %v550_v3 }
  0x54   : > { %vm334_vm2 = vcmp.lt.s32.totalorder %v333_v8, 192 }
  0x56   : > { %539 = vmatmul.msk.bf16.vlgmr.msra.gmra.mxu0 %vm312_vm1, %v291_v4 }
  0xd3   : > { %v325_v10 = vpop.f32.mrf.mxu0 }
  0xd4   : > { %v326_v11 = vadd.f32 %v678_v9, %v325_v10 }
  0xd6   : > { %v335_v12 = vsel %vm334_vm2, %v326_v11, -inf }
  0xd7   : > { %337 = vmax.xlane.f32.xlu0 %v335_v12  ;;  %363 = vst [vmem:[%s362_s29] sm:$0xff] %v335_v12 }
  0xdb   : > { %v327_v13 = vpop.f32.mrf.mxu0 }
 0x14a   : > { %v338_v16 = vpop.xlane.xlu0 %337 }
 0x14b   : > { %v339_v17 = vmax.f32 %v336_v15, %v338_v16 }
 0x14d   : > { %v340_v18 = vsub.f32 %v336_v15, %v339_v17  ;;  %358 = vst.msk [vmem:[#allocation3] sm:$0xff] %vm356_vm3, %v339_v17  ;;  %347 = vperm.xlu0 %677, %v339_v17  }
 0x14f   : > { %v341_v23 = vmul.f32 1.442695, %v340_v18 }
 0x1bf   : > { %v348_v19 = vpop.permute.xlu0 %347 }
 0x1c0   : > { %v350_v20 = vsub.f32 %v335_v12, %v348_v19 }
 0x1c2   : > { %v351_v21 = vmul.f32 1.442695, %v350_v20 }
 0x1c4   : > { %679 = vpow2.f32 %v351_v21 }
 0x1c5   : > { %681 = vpow2.f32 %v341_v23 }
 0x1ca   : > { %v680_v22 = vpop.eup %679 }
 0x1cb   : > { %353 = vadd.xlane.f32.xlu1 %v680_v22  ;;  %v682_v24 = vpop.eup %681 }
 0x1cc   : > { %v344_v26 = vmul.f32 %v682_v24, %v343_v25 }
 0x23e   : > { %v354_v27 = vpop.xlane.xlu1 %353 }
 0x23f   : > { %v355_v28 = vadd.f32 %v354_v27, %v344_v26 }
 0x241   : > { %357 = vst.msk [vmem:[#allocation4] sm:$0xff] %vm356_vm3, %v355_v28 }
 0x242 PF: > { %p542_p0 = scmp.ne.s32.totalorder %s834_s19, 1 }
 0x243   : > { %s543_s4 = sshll.u32 (!%p542_p0), %s830_s18, 7 }
 0x244   : > { %367 = sbr.rel (%p542_p0) target bundleno = 715 (0x2cb), region = 48  ;;  %s374_s8 = sshra.s32 (!%p542_p0), %s543_s4, 7 }
 0x245   : > { %s544_s15 = sshll.u32 (!%p542_p0), %s374_s8, 3 }
 0x246   : > { %s377_s26 = scalar_lea.vmem (!%p542_p0), [#allocation2], %s544_s15 }
 0x249   : > { %v370_v29 = vld [vmem:[#allocation4] sm:$0xff]  ;;  %v862_v30 = vmov 0   ;;  %v369_v32 = vld [vmem:[#allocation3] sm:$0xff]  ;;  %v378_v35 = vld [vmem:[%s377_s26] sm:$0xff] }
 0x24a   : > { %683 = vset.pattern.permute.xlu0 %v862_v30  ;;  %684 = vlog2.f32 %v370_v29 }
 0x250   : > { %v685_v31 = vpop.eup %684 }
 0x251   : > { %v372_v33 = vmul.f32 0.6931472, %v685_v31 }
 0x253   : > { %v373_v34 = vadd.f32 %v372_v33, %v369_v32 }
 0x255   : > { %381 = vperm.xlu0 %683, %v373_v34  }
 0x2c7   : > { %v382_v36 = vpop.permute.xlu0 %381 }
 0x2c8   : > { %v384_v37 = vsub.f32 %v378_v35, %v382_v36 }
 0x2ca   : > { %385 = vst [vmem:[%s260_s21] sm:$0xff] %v384_v37 }
 0x2cb PF: > { %s394_s5 = smul.u32 %s830_s18, %s834_s19  ;;  %s546_s7 = sshll.u32 %s838_s20, 1 }
 0x2cc   : > { %s402_s9 = sshll.u32 %s260_s21, 4  ;;  %s1155_s28 = sld [smem:[#allocation18_spill]]  ;;  %s403_s9 = int_to_ptr.vmem [resolvable:$true] %s402_s9 }
 0x2cd   : > { %s398_s25 = sadd.s32 %s546_s7, %s394_s5  ;;  %s387_s8 = scalar_lea.sflag [#allocation7], %s258_s22 }
 0x2ce   : > { %s547_s6 = sshll.u32 %s398_s25, 3 }
 0x2d2   : > { %s400_s29 = scalar_lea.hbm %s1155_s28, %s547_s6  ;;  %s736_s20 = scalar_lea.hbm %s1155_s28, 32 }
 0x2d3   : > { %s404_s4 = sshll.u32 %s400_s29, 4  ;;  %s405_s4 = int_to_ptr.hbm [resolvable:$true] %s404_s4 }
 0x2d4   : > { %s730_s15 = sshra.s32 %s405_s4, 4  ;;  %s731_s15 = int_to_ptr.hbm [resolvable:$true] %s730_s15 }
 0x2d5   : > { %s732_s26 = scalar_lea.hbm %s731_s15, 8  ;;  %p737_p7 = scmp.lt.s32.totalorder %s731_s15, %s1155_s28 }
 0x2d6   : > { %p733_p3 = scmp.ne.s32.totalorder %s731_s15, %s732_s26  ;;  %p738_p9 = scmp.lt.s32.totalorder %s736_s20, %s732_s26 }
 0x2d8   : > { %p734_p4 = pnand %p733_p3, %p1007_p1  ;;  %p739_p5 = por %p738_p9, %p737_p7 }
 0x2da   : > { %p735_p6 = pneg %p734_p4 }
 0x2dc   : > { %p740_p8 = pnand %p739_p5, %p735_p6 }
 0x2de   : > { %743 = shalt.err (!%p740_p8)
}
 0x2df   : > { %554 = dma.vmem_to_hbm [thread:$0]  (%p1007_p1), %s403_s9, 128, %s405_s4, %s387_s8  }
 0x2e0 PF: > { %p565_p10 = scmp.ge.s32.totalorder %s854_s24, 2  ;;  %s416_s22 = sand.u32 1, %s806_s12  }
 0x2e1   : > { %s417_s5 = scalar_lea.sflag [#allocation7], %s416_s22 }
 0x2e2   : > { %p561_p11 = pnand %p565_p10, %p1011_p2 }
 0x2e4   : > { %p562_p12 = pneg %p561_p11 }
 0x2e6   : > { %801 = dma.done.wait (%p562_p12), %s417_s5, 128  }
 0x2e7   : > { %803 = vsyncadd (%p562_p12), %s417_s5, 4294967168  ;;  %s19_s24 = sadd.s32 1, %s854_s24   ;;  %s1157_s30 = sld [smem:[#allocation17_spill]] }
 0x2e8   : > { %p1085_p13 = scmp.ge.s32.totalorder %s19_s24, 10   ;;  %s1158_s18 = sld [smem:[#allocation11_spill]] }
 0x2e9   : > { %s1159_s19 = sld [smem:[#allocation12_spill]]  ;;  %s1164_s12 = smov %s810_s13 }
 0x2ea   : > { %s1160_s20 = sld [smem:[#allocation13_spill]]  ;;  %s1165_s13 = smov %s814_s14 }
 0x2eb   : > { %s1161_s21 = sld [smem:[#allocation14_spill]]  ;;  %s1166_s14 = smov %s1005_s11 }
 0x2ec   : > { %s1162_s22 = sld [smem:[#allocation15_spill]]  ;;  %s1167_s15 = smov %s822_s16 }
 0x2ed   : > { %s1163_s23 = sld [smem:[#allocation16_spill]]  ;;  %s1168_s16 = smov %s826_s17 }
 0x2ee   : > { %s1169_s17 = smov %s1157_s30  ;;  %18 = sbr.rel (!%p1085_p13) target bundleno = 12 (0xc), region = 97 }
 0x2f3   :  { %423 = vsyncpa [#allocation6], 1 }
 0x2f4   :  { %425 = vsyncpa [#allocation6 + $0x1], 1 }
 0x2f5   :  { %426 = vsyncpa [#allocation7], 1 }
 0x2f6   :  { %428 = vsyncpa [#allocation7 + $0x1], 1 }

</bundles_post_ra>
